<compile_context>
chip_gen: v7x
topology: tpu7x:2x2x1
jax: 0.10.0
libtpu: 0.0.40
codegen_flags: <defaults>
</compile_context>

<pallas_src>
import functools
import math

import jax
import jax.numpy as jnp
from jax import lax
from jax.experimental import pallas as pl
from jax.experimental.pallas import tpu as pltpu


def _round_up(x, m):
    return ((x + m - 1) // m) * m


def patch_proj_kernel(x_ref, w_ref, b_ref, o_ref):
    # w_ref: (tn, K)   x_ref: (K, tm)   b_ref: (tn, 1)   o_ref: (tn, tm)
    acc = jnp.dot(w_ref[...], x_ref[...], preferred_element_type=jnp.float32)
    o_ref[...] = (acc + b_ref[...]).astype(o_ref.dtype)


def image_to_patch_2d(x, weight, bias, patch_dims, *, compute_dtype=None,
                      tile_m=512, tile_n=256):
    """Forward of ImageToPatch2D (normalization_layer=None), NCHW in / NCHW out."""
    B, C, H, W = x.shape
    ph, pw = patch_dims
    Cout = weight.shape[0]

    # Centered zero padding so H, W become multiples of the patch size
    # (same arithmetic as nn.ZeroPad2d in the PyTorch module).
    h_mod, w_mod = H % ph, W % pw
    pt = pb = plft = prgt = 0
    if h_mod:
        pad_h = ph - h_mod
        pt = pad_h // 2
        pb = pad_h - pt
    if w_mod:
        pad_w = pw - w_mod
        plft = pad_w // 2
        prgt = pad_w - plft
    xpad = jnp.pad(x, ((0, 0), (0, 0), (pt, pb), (plft, prgt)))

    Hp, Wp = xpad.shape[2], xpad.shape[3]
    Ho, Wo = Hp // ph, Wp // pw
    Mimg = Ho * Wo                    # spatial positions per image
    K = C * ph * pw                   # contraction size

    # im2col in (B, K, M) layout; K flattening order (C, kh, kw) matches the
    # OIHW Conv2d weight flattening.
    xp = (
        xpad.reshape(B, C, Ho, ph, Wo, pw)
        .transpose(0, 1, 3, 5, 2, 4)      # (B, C, ph, pw, Ho, Wo)
        .reshape(B, K, Mimg)
    )
    wmat = weight.reshape(Cout, K)        # (Cout, K)
    bvec = bias.reshape(Cout, 1)          # (Cout, 1)

    # ---- Tile sizing / alignment --------------------------------------------
    Kp = _round_up(K, 128)                          # lane-aligned contraction
    tn = min(tile_n, _round_up(Cout, 8))            # output-channel tile (sublanes)
    Np = _round_up(Cout, tn)
    tm = min(tile_m, _round_up(Mimg, 128))          # spatial tile (lanes, 128-dense)
    Mp = _round_up(Mimg, tm)

    # Zero-padding is mathematically inert (zero K columns, zero out rows/cols
    # that get sliced away afterwards).
    xp = jnp.pad(xp, ((0, 0), (0, Kp - K), (0, Mp - Mimg)))
    wmat = jnp.pad(wmat, ((0, Np - Cout), (0, Kp - K)))
    bvec = jnp.pad(bvec, ((0, Np - Cout), (0, 0)))

    if compute_dtype is not None:
        xp = xp.astype(compute_dtype)
        wmat = wmat.astype(compute_dtype)

    in_it = jnp.dtype(xp.dtype).itemsize
    out_it = jnp.dtype(x.dtype).itemsize

    # VMEM budget: double-buffered input/weight/bias/output tiles + headroom,
    # clamped so it is safe on v7x's 64 MiB physical VMEM.
    blk_bytes = (Kp * tm + tn * Kp + tn) * in_it + tn * tm * out_it
    vmem_limit = int(min(max(4 * blk_bytes + (2 << 20), 16 << 20), 48 << 20))

    cost = pl.CostEstimate(
        flops=2 * B * Np * Kp * Mp,
        transcendentals=0,
        bytes_accessed=(B * Kp * Mp + Np * Kp + Np) * in_it + B * Np * Mp * out_it,
    )

    grid = (Np // tn, B, Mp // tm)   # weight tile on the slowest axis -> reused

    out = pl.pallas_call(
        patch_proj_kernel,
        out_shape=jax.ShapeDtypeStruct((B, Np, Mp), x.dtype),
        grid=grid,
        in_specs=[
            pl.BlockSpec((None, Kp, tm), lambda j, b, i: (b, 0, i)),   # activations
            pl.BlockSpec((tn, Kp), lambda j, b, i: (j, 0)),            # weight
            pl.BlockSpec((tn, 1), lambda j, b, i: (j, 0)),             # bias
        ],
        out_specs=pl.BlockSpec((None, tn, tm), lambda j, b, i: (b, j, i)),
        compiler_params=pltpu.CompilerParams(
            dimension_semantics=("parallel", "parallel", "parallel"),
            vmem_limit_bytes=vmem_limit,
            allow_input_fusion=[True, False, False],
        ),
        cost_estimate=cost,
    )(xp, wmat, bvec)

    # Already channel-major: slice off padding and reshape -> NCHW (no transpose).
    out = out[:, :Cout, :Mimg]
    return out.reshape(B, Cout, Ho, Wo)

    # TODO(synk): normalization_layer is None in the default config; a LayerNorm
    # over the channel (tn) axis could be fused into the kernel epilogue if needed.


if __name__ == "__main__":
    # Module hyper-parameters (small, consistent with the module's forward):
    img_dims = (16, 16)
    patch_dims = (4, 4)
    in_channels = 4
    out_channels = 32
    batch = 2

    key = jax.random.PRNGKey(0)
    kx, kw, kb = jax.random.split(key, 3)

    # Deterministic parameter init mimicking nn.Conv2d default
    # (uniform(-1/sqrt(fan_in), 1/sqrt(fan_in))).
    fan_in = in_channels * patch_dims[0] * patch_dims[1]
    bound = 1.0 / math.sqrt(fan_in)
    weight = jax.random.uniform(
        kw, (out_channels, in_channels, patch_dims[0], patch_dims[1]),
        minval=-bound, maxval=bound, dtype=jnp.float32)
    bias = jax.random.uniform(
        kb, (out_channels,), minval=-bound, maxval=bound, dtype=jnp.float32)

    x = jax.random.normal(
        kx, (batch, in_channels, img_dims[0], img_dims[1]), dtype=jnp.float32)

    # jit the whole forward so the im2col pad/transpose can fuse into the
    # pallas operand (allow_input_fusion) instead of a separate HBM pass.
    fwd = jax.jit(functools.partial(image_to_patch_2d, patch_dims=patch_dims))
    out = jax.block_until_ready(fwd(x, weight, bias))

    # Reference check against XLA's strided convolution (same semantics as
    # nn.Conv2d(kernel_size=patch, stride=patch) on the zero-padded input).
    ref = lax.conv_general_dilated(
        x, weight, window_strides=patch_dims, padding="VALID",
        dimension_numbers=("NCHW", "OIHW", "NCHW"),
    ) + bias.reshape(1, out_channels, 1, 1)

    assert out.shape == (batch, out_channels,
                         img_dims[0] // patch_dims[0],
                         img_dims[1] // patch_dims[1])
    assert jnp.allclose(out, ref, atol=1e-4, rtol=1e-4)

    print("KERNEL_OK")
</pallas_src>

<mosaic_0001>
module attributes {stable_mosaic.version = 11 : i64} {
  func.func @patch_proj_kernel(%arg0: i32, %arg1: i32, %arg2: i32, %arg3: memref<1x128x128xf32, #tpu.memory_space<vmem>>, %arg4: memref<32x128xf32, #tpu.memory_space<vmem>>, %arg5: memref<32x1xf32, #tpu.memory_space<vmem>>, %arg6: memref<1x32x128xf32, #tpu.memory_space<vmem>>) attributes {dimension_semantics = [#tpu.dimension_semantics<parallel>, #tpu.dimension_semantics<parallel>, #tpu.dimension_semantics<parallel>], iteration_bounds = array<i64: 1, 2, 1>, scalar_prefetch = 0 : i64, scratch_operands = 0 : i64, tpu.core_type = #tpu.core_type<tc>, window_params = [{transform_indices = @transform_0, window_bounds = array<i64: 1, 128, 128>}, {transform_indices = @transform_1, window_bounds = array<i64: 32, 128>}, {transform_indices = @transform_2, window_bounds = array<i64: 32, 1>}, {transform_indices = @transform_3, window_bounds = array<i64: 1, 32, 128>}]} {
    %c0 = arith.constant 0 : index
    %c0_0 = arith.constant 0 : index
    %0 = vector.load %arg4[%c0, %c0_0] : memref<32x128xf32, #tpu.memory_space<vmem>>, vector<32x128xf32>
    %c0_1 = arith.constant 0 : index
    %c0_2 = arith.constant 0 : index
    %c0_3 = arith.constant 0 : index
    %1 = vector.load %arg3[%c0_1, %c0_2, %c0_3] : memref<1x128x128xf32, #tpu.memory_space<vmem>>, vector<1x128x128xf32>
    %2 = vector.shape_cast %1 : vector<1x128x128xf32> to vector<128x128xf32>
    %cst = arith.constant dense<0.000000e+00> : vector<32x128xf32>
    %3 = tpu.matmul %0, %2, %cst {dimension_numbers = #tpu.dot_dimension_numbers<[1], [0], [0], [1], [0, 0, 1, 1], [], []>} : vector<32x128xf32>, vector<128x128xf32>, vector<32x128xf32> -> vector<32x128xf32>
    %c0_4 = arith.constant 0 : index
    %c0_5 = arith.constant 0 : index
    %4 = vector.load %arg5[%c0_4, %c0_5] : memref<32x1xf32, #tpu.memory_space<vmem>>, vector<32x1xf32>
    %5 = vector.broadcast %4 : vector<32x1xf32> to vector<32x128xf32>
    %6 = arith.addf %3, %5 : vector<32x128xf32>
    %c0_6 = arith.constant 0 : index
    %c0_7 = arith.constant 0 : index
    %c0_8 = arith.constant 0 : index
    %7 = vector.load %arg6[%c0_6, %c0_7, %c0_8] : memref<1x32x128xf32, #tpu.memory_space<vmem>>, vector<1x32x128xf32>
    %8 = vector.shape_cast %7 : vector<1x32x128xf32> to vector<32x128xf32>
    %9 = vector.shape_cast %6 : vector<32x128xf32> to vector<1x32x128xf32>
    tpu.vector_store %arg6[%c0_6, %c0_7, %c0_8], %9 {strides = array<i32>} : memref<1x32x128xf32, #tpu.memory_space<vmem>>, vector<1x32x128xf32>,
    return
  }
  func.func @transform_0(%arg0: i32, %arg1: i32, %arg2: i32) -> (i32, i32, i32) {
    %c0_i32 = arith.constant 0 : i32
    %c0_i32_0 = arith.constant 0 : i32
    return %arg1, %c0_i32, %arg2 : i32, i32, i32
  }
  func.func @transform_1(%arg0: i32, %arg1: i32, %arg2: i32) -> (i32, i32) {
    %c0_i32 = arith.constant 0 : i32
    %c0_i32_0 = arith.constant 0 : i32
    return %arg0, %c0_i32 : i32, i32
  }
  func.func @transform_2(%arg0: i32, %arg1: i32, %arg2: i32) -> (i32, i32) {
    %c0_i32 = arith.constant 0 : i32
    %c0_i32_0 = arith.constant 0 : i32
    return %arg0, %c0_i32 : i32, i32
  }
  func.func @transform_3(%arg0: i32, %arg1: i32, %arg2: i32) -> (i32, i32, i32) {
    %c0_i32 = arith.constant 0 : i32
    return %arg1, %arg0, %arg2 : i32, i32, i32
  }
}

</mosaic_0001>

<bundles_post_ra>
// kernel: image_to_patch_2d.2
= control target key start
LH: loop header
LB: loop body
LE: loop exit
PB: predicated region body
PF: predicated region fallthrough
CT: control target
= control target key end

     0   :  { %s937_s17 = smov 0   ;;  %s939_s18 = smov 0   ;;  %s1016_s0 = inlined_call_operand.vmem [shape: f32[32,128], index: 0, kind: input, shape index: {}]   ;;  %s1017_s1 = inlined_call_operand.vmem [shape: f32[32,1], index: 1, kind: input, shape index: {}]   ;;  %s1018_s2 = inlined_call_operand.vmem [shape: f32[2,64,16], index: 2, kind: input, shape index: {}]   ;;  %s1019_s3 = inlined_call_operand.<no memory space> [shape: f32[], index: 3, kind: input, shape index: {}]   ;;  %s1020_s4 = inlined_call_operand.vmem [shape: f32[2,32,128], index: 4, kind: output, shape index: {}]  }
   0x1   :  { %v935_v0 = vstv %s1019_s3  ;;  %s941_s19 = smov 0  }
   0x2 LB: > { %s30_s3 = sadd.s32 1, %s900_s18  ;;  %p733_p0 = scmp.ge.s32.totalorder %s904_s19, 1  ;;  %s904_s19 = sphi %s941_s19, %s15_s19   ;;  %s900_s18 = sphi %s939_s18, %s1022_s18   ;;  %s896_s17 = sphi %s937_s17, %s1021_s17  }
   0x3   : > { %p32_p1 = scmp.ge.s32.totalorder %s30_s3, 2  ;;  %p193_p2 = scmp.lt.s32.totalorder %s904_s19, 3 }
   0x5   : > { %s1024_s3 = smov (%p32_p1, %s30_s3), 0  ;;  %p194_p3 = pnand %p733_p0, %p193_p2 }
   0x6   : > { %p241_p4 = scmp.lt.s32.totalorder (!%p194_p3), %s896_s17, 1  ;;  %v287_v1 = vlaneseq (!%p194_p3)  ;;  %v464_v2 = vld [vmem:[%s1016_s0] sm:$0xff] (!%p194_p3)  ;;  %v466_v3 = vld [vmem:[%s1016_s0 + $0x10] sm:$0xff] (!%p194_p3)  ;;  %v906_v7 = vmov (!%p194_p3), 0   ;;  %v487_v8 = vld [vmem:[%s1017_s1 + $0x18] sm:$0xff] (!%p194_p3)  ;;  %v823_v30 = vpack.c.bf16 (!%p194_p3), %v935_v0, %v935_v0 }
   0x7   : > { %197 = sbr.rel (%p194_p3) target bundleno = 269 (0x10d), region = 32  ;;  %801 = vmatprep.mubr.f32.mxu0 (!%p194_p3), %v464_v2  ;;  %804 = vmatprep.mubr.f32.mxu1 (!%p194_p3), %v466_v3  ;;  %v486_v4 = vld [vmem:[%s1017_s1 + $0x10] sm:$0xff] (!%p194_p3)  ;;  %v484_v5 = vld [vmem:[%s1017_s1] sm:$0xff] (!%p194_p3)  ;;  %v485_v9 = vld [vmem:[%s1017_s1 + $0x8] sm:$0xff] (!%p194_p3) }
   0x8   : > { %v288_v6 = vand.u32 (!%p194_p3), 127, %v287_v1  ;;  %881 = vset.pattern.permute.xlu1 (!%p194_p3), %v906_v7  ;;  %880 = vset.pattern.permute.xlu0 (!%p194_p3), %v906_v7  ;;  %v465_v31 = vld [vmem:[%s1016_s0 + $0x8] sm:$0xff] (!%p194_p3)  ;;  %v467_v32 = vld [vmem:[%s1016_s0 + $0x18] sm:$0xff] (!%p194_p3) }
   0x9   : > { %500 = vperm.xlu1 (!%p194_p3), %881, %v486_v4   ;;  %490 = vperm.xlu0 (!%p194_p3), %880, %v484_v5  }
   0xa   : > { %vm291_vm0 = vcmp.lt.s32.totalorder (!%p194_p3), %v288_v6, 16 }
   0xd   : > { %505 = vperm.xlu1 (!%p194_p3), %881, %v487_v8   ;;  %495 = vperm.xlu0 (!%p194_p3), %880, %v485_v9  }
   0xe   : > { %s1026_s17 = smov (!%p241_p4, %s896_s17), 1 }
   0xf   : > { %s747_s28 = sshll.u32 %s1026_s17, 6  ;;  %s748_s14 = sshll.u32 %s1026_s17, 5 }
  0x10   : > { %s248_s9 = scalar_lea.vmem %s1018_s2, %s747_s28  ;;  %s274_s20 = scalar_lea.vmem %s1020_s4, %s748_s14 }
  0x11   : > { %v280_v10 = vld [vmem:[%s248_s9] sm:$0xff]  ;;  %v738_v11 = vld [vmem:[%s248_s9 + $0x8] sm:$0xff]  ;;  %v739_v12 = vld [vmem:[%s248_s9 + $0x10] sm:$0xff] }
  0x12   : > { %v292_v13 = vsel %vm291_vm0, %v280_v10, %v935_v0  ;;  %v312_v14 = vsel %vm291_vm0, %v738_v11, %v935_v0  ;;  %v333_v15 = vsel %vm291_vm0, %v739_v12, %v935_v0  ;;  %v740_v16 = vld [vmem:[%s248_s9 + $0x18] sm:$0xff]  ;;  %v741_v17 = vld [vmem:[%s248_s9 + $0x20] sm:$0xff]  ;;  %v742_v18 = vld [vmem:[%s248_s9 + $0x28] sm:$0xff] }
  0x13   : > { %v807_v19 = vpack.c.bf16 %v312_v14, %v292_v13  ;;  %v354_v20 = vsel %vm291_vm0, %v740_v16, %v935_v0  ;;  %v375_v22 = vsel %vm291_vm0, %v741_v17, %v935_v0  ;;  %v396_v23 = vsel %vm291_vm0, %v742_v18, %v935_v0  ;;  %v743_v24 = vld [vmem:[%s248_s9 + $0x30] sm:$0xff]  ;;  %v744_v25 = vld [vmem:[%s248_s9 + $0x38] sm:$0xff] }
  0x14   : > { %v811_v21 = vpack.c.bf16 %v354_v20, %v333_v15  ;;  %v815_v26 = vpack.c.bf16 %v396_v23, %v375_v22  ;;  %v417_v27 = vsel %vm291_vm0, %v743_v24, %v935_v0  ;;  %v436_v28 = vsel %vm291_vm0, %v744_v25, %v935_v0 }
  0x15   : > { %808 = vmatprep.subr.bf16.mxu0 %v807_v19  ;;  %839 = vmatprep.subr.bf16.mxu1 %v807_v19  ;;  %v819_v29 = vpack.c.bf16 %v436_v28, %v417_v27 }
  0x16   : > { %810 = vmatpush3.bf16.msra.mxu0 %v807_v19  ;;  %847 = vmatpush3.bf16.msra.mxu1 %v807_v19 }
  0x17   : > { %812 = vmatprep.subr.bf16.mxu0 %v811_v21  ;;  %840 = vmatprep.subr.bf16.mxu1 %v811_v21 }
  0x1a   : > { %814 = vmatpush3.bf16.msra.mxu0 %v811_v21  ;;  %848 = vmatpush3.bf16.msra.mxu1 %v811_v21 }
  0x1b   : > { %816 = vmatprep.subr.bf16.mxu0 %v815_v26  ;;  %841 = vmatprep.subr.bf16.mxu1 %v815_v26 }
  0x1e   : > { %818 = vmatpush3.bf16.msra.mxu0 %v815_v26  ;;  %849 = vmatpush3.bf16.msra.mxu1 %v815_v26 }
  0x1f   : > { %820 = vmatprep.subr.bf16.mxu0 %v819_v29  ;;  %842 = vmatprep.subr.bf16.mxu1 %v819_v29 }
  0x22   : > { %822 = vmatpush3.bf16.msra.mxu0 %v819_v29  ;;  %850 = vmatpush3.bf16.msra.mxu1 %v819_v29 }
  0x23   : > { %824 = vmatprep.subr.bf16.mxu0 %v823_v30  ;;  %843 = vmatprep.subr.bf16.mxu1 %v823_v30 }
  0x26   : > { %826 = vmatpush3.bf16.msra.mxu0 %v823_v30  ;;  %851 = vmatpush3.bf16.msra.mxu1 %v823_v30 }
  0x27   : > { %828 = vmatprep.subr.bf16.mxu0 %v823_v30  ;;  %844 = vmatprep.subr.bf16.mxu1 %v823_v30 }
  0x2a   : > { %830 = vmatpush3.bf16.msra.mxu0 %v823_v30  ;;  %852 = vmatpush3.bf16.msra.mxu1 %v823_v30 }
  0x2b   : > { %832 = vmatprep.subr.bf16.mxu0 %v823_v30  ;;  %845 = vmatprep.subr.bf16.mxu1 %v823_v30 }
  0x2e   : > { %834 = vmatpush3.bf16.msra.mxu0 %v823_v30  ;;  %853 = vmatpush3.bf16.msra.mxu1 %v823_v30 }
  0x2f   : > { %836 = vmatprep.subr.bf16.mxu0 %v823_v30  ;;  %846 = vmatprep.subr.bf16.mxu1 %v823_v30 }
  0x32   : > { %838 = vmatpush3.bf16.msra.mxu0 %v823_v30  ;;  %854 = vmatpush3.bf16.msra.mxu1 %v823_v30 }
  0x35   : > { %802 = vmatmul.mubr.f32.vlgmr.msra.gmra.mrb[0].mxu0 %v465_v31  ;;  %805 = vmatmul.mubr.f32.vlgmr.msra.gmra.mrb[0].mxu1 %v467_v32 }
  0x88   : > { %v501_v33 = vpop.permute.xlu1 %500  ;;  %v491_v34 = vpop.permute.xlu0 %490 }
  0x8c   : > { %v506_v35 = vpop.permute.xlu1 %505  ;;  %v496_v36 = vpop.permute.xlu0 %495 }
 0x108   : > { %v803_v37 = vpop.f32.mrb[0].mxu0  ;;  %v806_v38 = vpop.f32.mrb[0].mxu1 }
 0x109   : > { %v580_v39 = vadd.f32 %v803_v37, %v496_v36  ;;  %v590_v40 = vadd.f32 %v806_v38, %v506_v35  ;;  %v574_v41 = vpop.f32.mrb[1].mxu0  ;;  %v584_v42 = vpop.f32.mrb[1].mxu1 }
 0x10a   : > { %v575_v43 = vadd.f32 %v574_v41, %v491_v34  ;;  %v585_v44 = vadd.f32 %v584_v42, %v501_v33 }
 0x10b   : > { %594 = vst [vmem:[%s274_s20 + $0x8] sm:$0xff] %v580_v39  ;;  %596 = vst [vmem:[%s274_s20 + $0x18] sm:$0xff] %v590_v40 }
 0x10c   : > { %593 = vst [vmem:[%s274_s20] sm:$0xff] %v575_v43  ;;  %595 = vst [vmem:[%s274_s20 + $0x10] sm:$0xff] %v585_v44 }
 0x10d PF: > { %s15_s19 = sadd.s32 1, %s904_s19   ;;  %s1021_s17 = smov %s900_s18 }
 0x10e   : > { %p12_p5 = scmp.ge.s32.totalorder %s15_s19, 4   ;;  %s1022_s18 = smov %s1024_s3 }
 0x110   :  { %14 = sbr.rel (!%p12_p5) target bundleno = 2 (0x2), region = 90 }

</bundles_post_ra>
